<compile_context>
chip_gen: v6e
topology: v6e:2x2x1
jax: 0.10.0
libtpu: 0.0.40
codegen_flags: <defaults>
</compile_context>

<pallas_src>
import jax
import jax.numpy as jnp
from jax.experimental import pallas as pl
from jax.experimental.pallas import tpu as pltpu


def _pifm_tile_kernel(f0_ref, f1_ref, f0t_ref, f1t_ref, f0b_ref, f1b_ref,
                      a_ref, dw_ref, tw1_ref, tw2_ref, out_ref):
    """One (batch b, row-tile h) grid step.

    f0_ref, f1_ref   : [1, TH, W, C]  centre tiles of the two inputs (NHWC)
    f0t_ref, f1t_ref : [1, 1, W, C]   row just above the tile (clamped at h==0)
    f0b_ref, f1b_ref : [1, 1, W, C]   row just below the tile (clamped at last h)
    a_ref            : [1, 1, 1, 2C]  softmax attention for this batch (precomputed)
    dw_ref           : [9, C]         depthwise 3x3 taps, row index = kh*3 + kw
    tw1_ref          : [C, hid]       t-branch 1x1 conv #1
    tw2_ref          : [hid, 2C]      t-branch 1x1 conv #2
    out_ref          : [1, TH, W, C]
    """
    h = pl.program_id(1)
    n_h = pl.num_programs(1)
    _, TH, W, C = out_ref.shape

    f0 = f0_ref[0].astype(jnp.float32)            # [TH, W, C]
    f1 = f1_ref[0].astype(jnp.float32)
    x = f0 + f1                                   # sum of the two C-groups

    # ---------------- depthwise 3x3, padding=1 -------------------------------
    # Vertical halo rows arrive as their own 1-row blocks; at the image border
    # the (clamped) row is replaced by zero padding via a select.
    top = jnp.where(h > 0,
                    (f0t_ref[0] + f1t_ref[0]).astype(jnp.float32), 0.0)   # [1, W, C]
    bot = jnp.where(h < n_h - 1,
                    (f0b_ref[0] + f1b_ref[0]).astype(jnp.float32), 0.0)   # [1, W, C]
    xh = jnp.concatenate([top, x, bot], axis=0)                           # [TH+2, W, C]

    col = jax.lax.broadcasted_iota(jnp.int32, (TH, W, C), 1)
    acc = jnp.zeros((TH, W, C), jnp.float32)
    for kh in range(3):
        xs = xh[kh:kh + TH]                       # leading-dim slice: no tile crossing
        for kw in range(3):
            if kw == 0:       # west neighbour: bring column w-1 to w, zero at w==0
                term = jnp.where(col >= 1, pltpu.roll(xs, 1, axis=1), 0.0)
            elif kw == 2:     # east neighbour: bring column w+1 to w, zero at w==W-1
                term = jnp.where(col <= W - 2, pltpu.roll(xs, W - 1, axis=1), 0.0)
            else:
                term = xs
            acc = acc + term * dw_ref[kh * 3 + kw]     # [C] tap broadcasts over lanes

    # ---------------- t branch: 1x1 -> ReLU -> 1x1 -> sigmoid ----------------
    # hid = C // 8 is tiny; at production C consider padding hid toward the MXU
    # tile or doing these as VPU broadcast-MACs (left as-is at these shapes).
    pix = acc.reshape(TH * W, C)
    ht = jnp.maximum(
        jnp.dot(pix, tw1_ref[...], preferred_element_type=jnp.float32), 0.0)
    tl = jnp.dot(ht, tw2_ref[...], preferred_element_type=jnp.float32)    # [THW, 2C]
    # sigmoid = 1 / (1 + exp(-x)): exp on the EUP, approx reciprocal on the EUP.
    t = pl.reciprocal(1.0 + jnp.exp(-tl), approx=True).reshape(TH, W, 2 * C)

    # ---------------- fuse: out = a0 + a1 + t0*(f0-a0) + t1*(f1-a1) ----------
    a = a_ref[0, 0, 0].astype(jnp.float32)        # [2C]
    a0 = a[:C]
    a1 = a[C:]
    t0 = t[..., :C]
    t1 = t[..., C:]
    out = (a0 + a1) + t0 * (f0 - a0) + t1 * (f1 - a1)
    out_ref[0] = out.astype(out_ref.dtype)


def _pick_block_h(H, W, C, dtype_bytes, budget_bytes=8 << 20):
    """Largest divisor of H whose per-step VMEM footprint fits the budget
    (2 inputs + 1 output, double-buffered, plus ~4 f32 working tiles)."""
    for th in range(H, 0, -1):
        if H % th:
            continue
        footprint = (3 * 2 * dtype_bytes + 4 * 4) * th * W * C
        if footprint <= budget_bytes:
            return th
    return 1


def pifm_forward_nhwc(f0, f1, params, *, block_h=None):
    """PIFM forward.  f0, f1: [B, H, W, C] (channels-last).  Returns [B, H, W, C].

    params = (dw9c [9,C], aw1 [C,hid], aw2 [hid,2C], tw1 [C,hid], tw2 [hid,2C]).
    """
    dw9c, aw1, aw2, tw1, tw2 = params
    B, H, W, C = f0.shape
    hid = aw1.shape[1]
    assert f1.shape == (B, H, W, C)
    assert dw9c.shape == (9, C) and aw1.shape == (C, hid)
    assert aw2.shape == (hid, 2 * C) and tw1.shape == (C, hid)
    assert tw2.shape == (hid, 2 * C)

    # ---- branch 'a' (hoisted): global avg-pool -> 1x1 -> ReLU -> 1x1 -> softmax.
    # Tiny ([B, 2C]); computing it here is what allows the main kernel to tile H.
    pooled = (jnp.sum(f0.astype(jnp.float32), axis=(1, 2)) +
              jnp.sum(f1.astype(jnp.float32), axis=(1, 2))) * (1.0 / float(H * W))
    a = jax.nn.softmax(
        jnp.maximum(pooled @ aw1.astype(jnp.float32), 0.0) @ aw2.astype(jnp.float32),
        axis=-1)                                                        # [B, 2C]
    a4d = a.reshape(B, 1, 1, 2 * C)

    if block_h is None:
        block_h = _pick_block_h(H, W, C, f0.dtype.itemsize)
    assert H % block_h == 0, (H, block_h)
    n_h = H // block_h

    tile = lambda b, h: (b, h, 0, 0)
    # Block size along H is 1 for the halo inputs, so the index_map's second
    # entry is an element row index: the row just above / below the tile,
    # clamped into range at the border (the kernel masks it to zero there).
    row_above = lambda b, h: (b, jnp.maximum(h * block_h - 1, 0), 0, 0)
    row_below = lambda b, h: (b, jnp.minimum((h + 1) * block_h, H - 1), 0, 0)

    def full(shape):
        return pl.BlockSpec(shape, lambda b, h: (0,) * len(shape))

    out = pl.pallas_call(
        _pifm_tile_kernel,
        out_shape=jax.ShapeDtypeStruct((B, H, W, C), f0.dtype),
        grid=(B, n_h),
        in_specs=[
            pl.BlockSpec((1, block_h, W, C), tile),          # f0 centre tile
            pl.BlockSpec((1, block_h, W, C), tile),          # f1 centre tile
            pl.BlockSpec((1, 1, W, C), row_above),           # f0 top halo row
            pl.BlockSpec((1, 1, W, C), row_above),           # f1 top halo row
            pl.BlockSpec((1, 1, W, C), row_below),           # f0 bottom halo row
            pl.BlockSpec((1, 1, W, C), row_below),           # f1 bottom halo row
            pl.BlockSpec((1, 1, 1, 2 * C), lambda b, h: (b, 0, 0, 0)),   # a
            full((9, C)),                                     # depthwise taps
            full((C, hid)),                                   # tw1
            full((hid, 2 * C)),                               # tw2
        ],
        out_specs=pl.BlockSpec((1, block_h, W, C), tile),
        compiler_params=pltpu.CompilerParams(
            # No carried state between grid steps -> both axes parallel; on
            # megacore parts (v7x) they can be sharded across TensorCores.
            dimension_semantics=("parallel", "parallel"),
            vmem_limit_bytes=32 * 1024 * 1024,
        ),
    )(f0, f1, f0, f1, f0, f1, a4d, dw9c, tw1, tw2)
    return out


def pifm_forward(f0_nchw, f1_nchw, params, *, block_h=None):
    """Drop-in NCHW (PyTorch-layout) adapter.

    Note: each transpose below is a full HBM round trip of the tensor; prefer
    calling pifm_forward_nhwc directly when the surrounding model is (or can
    be made) channels-last.
    """
    f0 = jnp.transpose(f0_nchw, (0, 2, 3, 1))
    f1 = jnp.transpose(f1_nchw, (0, 2, 3, 1))
    out = pifm_forward_nhwc(f0, f1, params, block_h=block_h)
    return jnp.transpose(out, (0, 3, 1, 2))


def ref_pifm(f0, f1, dw9c, aw1, aw2, tw1, tw2):
    """Pure-JAX reference mirroring the PyTorch forward (NCHW)."""
    B, C, H, W = f0.shape
    x = f0 + f1
    pooled = jnp.mean(x, axis=(2, 3))                             # [B, C]
    a = jax.nn.softmax(jax.nn.relu(pooled @ aw1) @ aw2, axis=-1)  # [B, 2C]

    xp = jnp.pad(x, ((0, 0), (0, 0), (1, 1), (1, 1)))
    acc = jnp.zeros_like(x)
    for kh in range(3):
        for kw in range(3):
            tap = dw9c[kh * 3 + kw]                               # [C]
            acc = acc + xp[:, :, kh:kh + H, kw:kw + W] * tap[None, :, None, None]

    xt = acc.transpose(0, 2, 3, 1).reshape(-1, C)
    t = jax.nn.sigmoid(jax.nn.relu(xt @ tw1) @ tw2)               # [BHW, 2C]
    t = t.reshape(B, H, W, 2 * C).transpose(0, 3, 1, 2)           # [B, 2C, H, W]

    cat = jnp.concatenate([f0, f1], axis=1)                       # [B, 2C, H, W]
    j = (1.0 - t) * a[:, :, None, None] + t * cat
    return j.reshape(B, 2, C, H, W).sum(axis=1)                   # [B, C, H, W]


if __name__ == "__main__":
    B, C, H, W = 2, 16, 24, 8
    reduction = 8
    hidden = C // reduction

    key = jax.random.PRNGKey(0)
    k0, k1, k2, k3, k4, k5, k6 = jax.random.split(key, 7)

    # PIFM.forward takes a list of 2 NCHW feature maps.
    f0 = jax.random.normal(k0, (B, C, H, W), jnp.float32)
    f1 = jax.random.normal(k1, (B, C, H, W), jnp.float32)

    # Synthetic weights with the PyTorch __init__ shapes (bias=False):
    dw_w = jax.random.normal(k2, (C, 3, 3), jnp.float32) * 0.2        # t[0]: [C,1,3,3]
    a_w1 = jax.random.normal(k3, (hidden, C), jnp.float32) * 0.2      # a[0]: [hid,C,1,1]
    a_w2 = jax.random.normal(k4, (2 * C, hidden), jnp.float32) * 0.2  # a[2]: [2C,hid,1,1]
    t_w1 = jax.random.normal(k5, (hidden, C), jnp.float32) * 0.2      # t[1]: [hid,C,1,1]
    t_w2 = jax.random.normal(k6, (2 * C, hidden), jnp.float32) * 0.2  # t[3]: [2C,hid,1,1]

    # Re-layout weights for the kernel (matmul-friendly, channels-last).
    dw9c = dw_w.reshape(C, 9).T        # [9, C], row index = kh*3 + kw
    aw1, aw2 = a_w1.T, a_w2.T          # [C,hid], [hid,2C]
    tw1, tw2 = t_w1.T, t_w2.T
    params = (dw9c, aw1, aw2, tw1, tw2)

    # block_h=8 -> 3 row-tiles per image: exercises the top-border, interior
    # halo and bottom-border paths of the tiled depthwise conv.
    out = pifm_forward(f0, f1, params, block_h=8)
    out = jax.block_until_ready(out)

    ref = ref_pifm(f0, f1, dw9c, aw1, aw2, tw1, tw2)
    assert out.shape == (B, C, H, W), out.shape
    err = float(jnp.max(jnp.abs(out - ref)))
    # 5e-3 tolerance: the in-kernel sigmoid uses the EUP approximate reciprocal
    # (pl.reciprocal(approx=True)); set approx=False for bit-tighter math.
    assert jnp.allclose(out, ref, atol=5e-3, rtol=5e-3), f"max abs err = {err}"
    print("KERNEL_OK")
</pallas_src>

<mosaic_0001>
module attributes {stable_mosaic.version = 11 : i64} {
  func.func @_pifm_tile_kernel(%arg0: i32, %arg1: i32, %arg2: memref<1x8x8x16xf32, #tpu.memory_space<vmem>>, %arg3: memref<1x8x8x16xf32, #tpu.memory_space<vmem>>, %arg4: memref<1x1x8x16xf32, #tpu.memory_space<vmem>>, %arg5: memref<1x1x8x16xf32, #tpu.memory_space<vmem>>, %arg6: memref<1x1x8x16xf32, #tpu.memory_space<vmem>>, %arg7: memref<1x1x8x16xf32, #tpu.memory_space<vmem>>, %arg8: memref<1x1x1x32xf32, #tpu.memory_space<vmem>>, %arg9: memref<9x16xf32, #tpu.memory_space<vmem>>, %arg10: memref<16x2xf32, #tpu.memory_space<vmem>>, %arg11: memref<2x32xf32, #tpu.memory_space<vmem>>, %arg12: memref<1x8x8x16xf32, #tpu.memory_space<vmem>>) attributes {dimension_semantics = [#tpu.dimension_semantics<parallel>, #tpu.dimension_semantics<parallel>], iteration_bounds = array<i64: 2, 3>, scalar_prefetch = 0 : i64, scratch_operands = 0 : i64, tpu.core_type = #tpu.core_type<tc>, window_params = [{transform_indices = @transform_0, window_bounds = array<i64: 1, 8, 8, 16>}, {transform_indices = @transform_1, window_bounds = array<i64: 1, 8, 8, 16>}, {transform_indices = @transform_2, window_bounds = array<i64: 1, 1, 8, 16>}, {transform_indices = @transform_3, window_bounds = array<i64: 1, 1, 8, 16>}, {transform_indices = @transform_4, window_bounds = array<i64: 1, 1, 8, 16>}, {transform_indices = @transform_5, window_bounds = array<i64: 1, 1, 8, 16>}, {transform_indices = @transform_6, window_bounds = array<i64: 1, 1, 1, 32>}, {pipeline_mode = #tpu.pipeline_mode<synchronous>, transform_indices = @transform_7, window_bounds = array<i64: 9, 16>}, {pipeline_mode = #tpu.pipeline_mode<synchronous>, transform_indices = @transform_8, window_bounds = array<i64: 16, 2>}, {pipeline_mode = #tpu.pipeline_mode<synchronous>, transform_indices = @transform_9, window_bounds = array<i64: 2, 32>}, {transform_indices = @transform_10, window_bounds = array<i64: 1, 8, 8, 16>}]} {
    %c0 = arith.constant 0 : index
    %c0_0 = arith.constant 0 : index
    %c0_1 = arith.constant 0 : index
    %c0_2 = arith.constant 0 : index
    %0 = vector.load %arg2[%c0, %c0_0, %c0_1, %c0_2] : memref<1x8x8x16xf32, #tpu.memory_space<vmem>>, vector<1x8x8x16xf32>
    %1 = vector.shape_cast %0 : vector<1x8x8x16xf32> to vector<8x8x16xf32>
    %c0_3 = arith.constant 0 : index
    %c0_4 = arith.constant 0 : index
    %c0_5 = arith.constant 0 : index
    %c0_6 = arith.constant 0 : index
    %2 = vector.load %arg3[%c0_3, %c0_4, %c0_5, %c0_6] : memref<1x8x8x16xf32, #tpu.memory_space<vmem>>, vector<1x8x8x16xf32>
    %3 = vector.shape_cast %2 : vector<1x8x8x16xf32> to vector<8x8x16xf32>
    %4 = arith.addf %1, %3 : vector<8x8x16xf32>
    %c0_i32 = arith.constant 0 : i32
    %5 = arith.cmpi sgt, %arg1, %c0_i32 : i32
    %c0_7 = arith.constant 0 : index
    %c0_8 = arith.constant 0 : index
    %c0_9 = arith.constant 0 : index
    %c0_10 = arith.constant 0 : index
    %6 = vector.load %arg4[%c0_7, %c0_8, %c0_9, %c0_10] : memref<1x1x8x16xf32, #tpu.memory_space<vmem>>, vector<1x1x8x16xf32>
    %7 = vector.shape_cast %6 : vector<1x1x8x16xf32> to vector<1x8x16xf32>
    %c0_11 = arith.constant 0 : index
    %c0_12 = arith.constant 0 : index
    %c0_13 = arith.constant 0 : index
    %c0_14 = arith.constant 0 : index
    %8 = vector.load %arg5[%c0_11, %c0_12, %c0_13, %c0_14] : memref<1x1x8x16xf32, #tpu.memory_space<vmem>>, vector<1x1x8x16xf32>
    %9 = vector.shape_cast %8 : vector<1x1x8x16xf32> to vector<1x8x16xf32>
    %10 = arith.addf %7, %9 : vector<1x8x16xf32>
    %cst = arith.constant 0.000000e+00 : f32
    %11 = vector.broadcast %cst : f32 to vector<1x8x16xf32>
    %12 = arith.select %5, %10, %11 : vector<1x8x16xf32>
    %c2_i32 = arith.constant 2 : i32
    %13 = arith.cmpi slt, %arg1, %c2_i32 : i32
    %c0_15 = arith.constant 0 : index
    %c0_16 = arith.constant 0 : index
    %c0_17 = arith.constant 0 : index
    %c0_18 = arith.constant 0 : index
    %14 = vector.load %arg6[%c0_15, %c0_16, %c0_17, %c0_18] : memref<1x1x8x16xf32, #tpu.memory_space<vmem>>, vector<1x1x8x16xf32>
    %15 = vector.shape_cast %14 : vector<1x1x8x16xf32> to vector<1x8x16xf32>
    %c0_19 = arith.constant 0 : index
    %c0_20 = arith.constant 0 : index
    %c0_21 = arith.constant 0 : index
    %c0_22 = arith.constant 0 : index
    %16 = vector.load %arg7[%c0_19, %c0_20, %c0_21, %c0_22] : memref<1x1x8x16xf32, #tpu.memory_space<vmem>>, vector<1x1x8x16xf32>
    %17 = vector.shape_cast %16 : vector<1x1x8x16xf32> to vector<1x8x16xf32>
    %18 = arith.addf %15, %17 : vector<1x8x16xf32>
    %cst_23 = arith.constant 0.000000e+00 : f32
    %19 = vector.broadcast %cst_23 : f32 to vector<1x8x16xf32>
    %20 = arith.select %13, %18, %19 : vector<1x8x16xf32>
    %21 = tpu.concatenate %12, %4, %20 in 0 : vector<1x8x16xf32>, vector<8x8x16xf32>, vector<1x8x16xf32> -> vector<10x8x16xf32>
    %22 = tpu.iota {dimensions = array<i32: 1>} : vector<8x8x16xi32>
    %cst_24 = arith.constant 0.000000e+00 : f32
    %23 = vector.broadcast %cst_24 : f32 to vector<8x8x16xf32>
    %24 = vector.extract_strided_slice %21 {offsets = [0, 0, 0], sizes = [8, 8, 16], strides = [1, 1, 1]} : vector<10x8x16xf32> to vector<8x8x16xf32>
    %c1_i32 = arith.constant 1 : i32
    %25 = vector.broadcast %c1_i32 : i32 to vector<8x8x16xi32>
    %26 = arith.cmpi sge, %22, %25 : vector<8x8x16xi32>
    %c1_i32_25 = arith.constant 1 : i32
    %27 = tpu.dynamic_rotate %24 by %c1_i32_25 dim 1 : vector<8x8x16xf32>, i32 -> vector<8x8x16xf32>
    %cst_26 = arith.constant 0.000000e+00 : f32
    %28 = vector.broadcast %cst_26 : f32 to vector<8x8x16xf32>
    %29 = arith.select %26, %27, %28 : vector<8x8x16xi1>, vector<8x8x16xf32>
    %c0_27 = arith.constant 0 : index
    %c0_28 = arith.constant 0 : index
    %30 = vector.load %arg9[%c0_27, %c0_28] : memref<9x16xf32, #tpu.memory_space<vmem>>, vector<1x16xf32>
    %31 = vector.shape_cast %30 : vector<1x16xf32> to vector<16xf32>
    %32 = vector.shape_cast %31 : vector<16xf32> to vector<1x1x16xf32>
    %33 = vector.broadcast %32 : vector<1x1x16xf32> to vector<8x8x16xf32>
    %34 = arith.mulf %29, %33 : vector<8x8x16xf32>
    %35 = arith.addf %23, %34 : vector<8x8x16xf32>
    %c1 = arith.constant 1 : index
    %c0_29 = arith.constant 0 : index
    %36 = vector.load %arg9[%c1, %c0_29] : memref<9x16xf32, #tpu.memory_space<vmem>>, vector<1x16xf32>
    %37 = vector.shape_cast %36 : vector<1x16xf32> to vector<16xf32>
    %38 = vector.shape_cast %37 : vector<16xf32> to vector<1x1x16xf32>
    %39 = vector.broadcast %38 : vector<1x1x16xf32> to vector<8x8x16xf32>
    %40 = arith.mulf %24, %39 : vector<8x8x16xf32>
    %41 = arith.addf %35, %40 : vector<8x8x16xf32>
    %c6_i32 = arith.constant 6 : i32
    %42 = vector.broadcast %c6_i32 : i32 to vector<8x8x16xi32>
    %43 = arith.cmpi sle, %22, %42 : vector<8x8x16xi32>
    %c7_i32 = arith.constant 7 : i32
    %44 = tpu.dynamic_rotate %24 by %c7_i32 dim 1 : vector<8x8x16xf32>, i32 -> vector<8x8x16xf32>
    %cst_30 = arith.constant 0.000000e+00 : f32
    %45 = vector.broadcast %cst_30 : f32 to vector<8x8x16xf32>
    %46 = arith.select %43, %44, %45 : vector<8x8x16xi1>, vector<8x8x16xf32>
    %c2 = arith.constant 2 : index
    %c0_31 = arith.constant 0 : index
    %47 = vector.load %arg9[%c2, %c0_31] : memref<9x16xf32, #tpu.memory_space<vmem>>, vector<1x16xf32>
    %48 = vector.shape_cast %47 : vector<1x16xf32> to vector<16xf32>
    %49 = vector.shape_cast %48 : vector<16xf32> to vector<1x1x16xf32>
    %50 = vector.broadcast %49 : vector<1x1x16xf32> to vector<8x8x16xf32>
    %51 = arith.mulf %46, %50 : vector<8x8x16xf32>
    %52 = arith.addf %41, %51 : vector<8x8x16xf32>
    %53 = vector.extract_strided_slice %21 {offsets = [1, 0, 0], sizes = [8, 8, 16], strides = [1, 1, 1]} : vector<10x8x16xf32> to vector<8x8x16xf32>
    %c1_i32_32 = arith.constant 1 : i32
    %54 = vector.broadcast %c1_i32_32 : i32 to vector<8x8x16xi32>
    %55 = arith.cmpi sge, %22, %54 : vector<8x8x16xi32>
    %c1_i32_33 = arith.constant 1 : i32
    %56 = tpu.dynamic_rotate %53 by %c1_i32_33 dim 1 : vector<8x8x16xf32>, i32 -> vector<8x8x16xf32>
    %cst_34 = arith.constant 0.000000e+00 : f32
    %57 = vector.broadcast %cst_34 : f32 to vector<8x8x16xf32>
    %58 = arith.select %55, %56, %57 : vector<8x8x16xi1>, vector<8x8x16xf32>
    %c3 = arith.constant 3 : index
    %c0_35 = arith.constant 0 : index
    %59 = vector.load %arg9[%c3, %c0_35] : memref<9x16xf32, #tpu.memory_space<vmem>>, vector<1x16xf32>
    %60 = vector.shape_cast %59 : vector<1x16xf32> to vector<16xf32>
    %61 = vector.shape_cast %60 : vector<16xf32> to vector<1x1x16xf32>
    %62 = vector.broadcast %61 : vector<1x1x16xf32> to vector<8x8x16xf32>
    %63 = arith.mulf %58, %62 : vector<8x8x16xf32>
    %64 = arith.addf %52, %63 : vector<8x8x16xf32>
    %c4 = arith.constant 4 : index
    %c0_36 = arith.constant 0 : index
    %65 = vector.load %arg9[%c4, %c0_36] : memref<9x16xf32, #tpu.memory_space<vmem>>, vector<1x16xf32>
    %66 = vector.shape_cast %65 : vector<1x16xf32> to vector<16xf32>
    %67 = vector.shape_cast %66 : vector<16xf32> to vector<1x1x16xf32>
    %68 = vector.broadcast %67 : vector<1x1x16xf32> to vector<8x8x16xf32>
    %69 = arith.mulf %53, %68 : vector<8x8x16xf32>
    %70 = arith.addf %64, %69 : vector<8x8x16xf32>
    %c6_i32_37 = arith.constant 6 : i32
    %71 = vector.broadcast %c6_i32_37 : i32 to vector<8x8x16xi32>
    %72 = arith.cmpi sle, %22, %71 : vector<8x8x16xi32>
    %c7_i32_38 = arith.constant 7 : i32
    %73 = tpu.dynamic_rotate %53 by %c7_i32_38 dim 1 : vector<8x8x16xf32>, i32 -> vector<8x8x16xf32>
    %cst_39 = arith.constant 0.000000e+00 : f32
    %74 = vector.broadcast %cst_39 : f32 to vector<8x8x16xf32>
    %75 = arith.select %72, %73, %74 : vector<8x8x16xi1>, vector<8x8x16xf32>
    %c5 = arith.constant 5 : index
    %c0_40 = arith.constant 0 : index
    %76 = vector.load %arg9[%c5, %c0_40] : memref<9x16xf32, #tpu.memory_space<vmem>>, vector<1x16xf32>
    %77 = vector.shape_cast %76 : vector<1x16xf32> to vector<16xf32>
    %78 = vector.shape_cast %77 : vector<16xf32> to vector<1x1x16xf32>
    %79 = vector.broadcast %78 : vector<1x1x16xf32> to vector<8x8x16xf32>
    %80 = arith.mulf %75, %79 : vector<8x8x16xf32>
    %81 = arith.addf %70, %80 : vector<8x8x16xf32>
    %82 = vector.extract_strided_slice %21 {offsets = [2, 0, 0], sizes = [8, 8, 16], strides = [1, 1, 1]} : vector<10x8x16xf32> to vector<8x8x16xf32>
    %c1_i32_41 = arith.constant 1 : i32
    %83 = vector.broadcast %c1_i32_41 : i32 to vector<8x8x16xi32>
    %84 = arith.cmpi sge, %22, %83 : vector<8x8x16xi32>
    %c1_i32_42 = arith.constant 1 : i32
    %85 = tpu.dynamic_rotate %82 by %c1_i32_42 dim 1 : vector<8x8x16xf32>, i32 -> vector<8x8x16xf32>
    %cst_43 = arith.constant 0.000000e+00 : f32
    %86 = vector.broadcast %cst_43 : f32 to vector<8x8x16xf32>
    %87 = arith.select %84, %85, %86 : vector<8x8x16xi1>, vector<8x8x16xf32>
    %c6 = arith.constant 6 : index
    %c0_44 = arith.constant 0 : index
    %88 = vector.load %arg9[%c6, %c0_44] : memref<9x16xf32, #tpu.memory_space<vmem>>, vector<1x16xf32>
    %89 = vector.shape_cast %88 : vector<1x16xf32> to vector<16xf32>
    %90 = vector.shape_cast %89 : vector<16xf32> to vector<1x1x16xf32>
    %91 = vector.broadcast %90 : vector<1x1x16xf32> to vector<8x8x16xf32>
    %92 = arith.mulf %87, %91 : vector<8x8x16xf32>
    %93 = arith.addf %81, %92 : vector<8x8x16xf32>
    %c7 = arith.constant 7 : index
    %c0_45 = arith.constant 0 : index
    %94 = vector.load %arg9[%c7, %c0_45] : memref<9x16xf32, #tpu.memory_space<vmem>>, vector<1x16xf32>
    %95 = vector.shape_cast %94 : vector<1x16xf32> to vector<16xf32>
    %96 = vector.shape_cast %95 : vector<16xf32> to vector<1x1x16xf32>
    %97 = vector.broadcast %96 : vector<1x1x16xf32> to vector<8x8x16xf32>
    %98 = arith.mulf %82, %97 : vector<8x8x16xf32>
    %99 = arith.addf %93, %98 : vector<8x8x16xf32>
    %c6_i32_46 = arith.constant 6 : i32
    %100 = vector.broadcast %c6_i32_46 : i32 to vector<8x8x16xi32>
    %101 = arith.cmpi sle, %22, %100 : vector<8x8x16xi32>
    %c7_i32_47 = arith.constant 7 : i32
    %102 = tpu.dynamic_rotate %82 by %c7_i32_47 dim 1 : vector<8x8x16xf32>, i32 -> vector<8x8x16xf32>
    %cst_48 = arith.constant 0.000000e+00 : f32
    %103 = vector.broadcast %cst_48 : f32 to vector<8x8x16xf32>
    %104 = arith.select %101, %102, %103 : vector<8x8x16xi1>, vector<8x8x16xf32>
    %c8 = arith.constant 8 : index
    %c0_49 = arith.constant 0 : index
    %105 = vector.load %arg9[%c8, %c0_49] : memref<9x16xf32, #tpu.memory_space<vmem>>, vector<1x16xf32>
    %106 = vector.shape_cast %105 : vector<1x16xf32> to vector<16xf32>
    %107 = vector.shape_cast %106 : vector<16xf32> to vector<1x1x16xf32>
    %108 = vector.broadcast %107 : vector<1x1x16xf32> to vector<8x8x16xf32>
    %109 = arith.mulf %104, %108 : vector<8x8x16xf32>
    %110 = arith.addf %99, %109 : vector<8x8x16xf32>
    %111 = vector.shape_cast %110 : vector<8x8x16xf32> to vector<64x16xf32>
    %c0_50 = arith.constant 0 : index
    %c0_51 = arith.constant 0 : index
    %112 = vector.load %arg10[%c0_50, %c0_51] : memref<16x2xf32, #tpu.memory_space<vmem>>, vector<16x2xf32>
    %cst_52 = arith.constant dense<0.000000e+00> : vector<64x2xf32>
    %113 = tpu.matmul %111, %112, %cst_52 {dimension_numbers = #tpu.dot_dimension_numbers<[1], [0], [0], [1], [0, 0, 1, 1], [], []>} : vector<64x16xf32>, vector<16x2xf32>, vector<64x2xf32> -> vector<64x2xf32>
    %cst_53 = arith.constant 0.000000e+00 : f32
    %114 = vector.broadcast %cst_53 : f32 to vector<64x2xf32>
    %115 = arith.maximumf %113, %114 : vector<64x2xf32>
    %c0_54 = arith.constant 0 : index
    %c0_55 = arith.constant 0 : index
    %116 = vector.load %arg11[%c0_54, %c0_55] : memref<2x32xf32, #tpu.memory_space<vmem>>, vector<2x32xf32>
    %cst_56 = arith.constant dense<0.000000e+00> : vector<64x32xf32>
    %117 = tpu.matmul %115, %116, %cst_56 {dimension_numbers = #tpu.dot_dimension_numbers<[1], [0], [0], [1], [0, 0, 1, 1], [], []>} : vector<64x2xf32>, vector<2x32xf32>, vector<64x32xf32> -> vector<64x32xf32>
    %cst_57 = arith.constant 0.000000e+00 : f32
    %118 = vector.broadcast %cst_57 : f32 to vector<64x32xf32>
    %119 = arith.subf %118, %117 : vector<64x32xf32>
    %120 = math.exp %119 : vector<64x32xf32>
    %cst_58 = arith.constant 1.000000e+00 : f32
    %121 = vector.broadcast %cst_58 : f32 to vector<64x32xf32>
    %122 = arith.addf %121, %120 : vector<64x32xf32>
    %123 = tpu.reciprocal %122 {approx = true} : vector<64x32xf32> -> vector<64x32xf32>
    %124 = vector.shape_cast %123 : vector<64x32xf32> to vector<8x8x32xf32>
    %c0_59 = arith.constant 0 : index
    %c0_60 = arith.constant 0 : index
    %c0_61 = arith.constant 0 : index
    %c0_62 = arith.constant 0 : index
    %125 = vector.load %arg8[%c0_59, %c0_60, %c0_61, %c0_62] : memref<1x1x1x32xf32, #tpu.memory_space<vmem>>, vector<1x1x1x32xf32>
    %126 = vector.shape_cast %125 : vector<1x1x1x32xf32> to vector<32xf32>
    %127 = vector.extract_strided_slice %126 {offsets = [0], sizes = [16], strides = [1]} : vector<32xf32> to vector<16xf32>
    %128 = vector.extract_strided_slice %126 {offsets = [16], sizes = [16], strides = [1]} : vector<32xf32> to vector<16xf32>
    %129 = vector.extract_strided_slice %124 {offsets = [0, 0, 0], sizes = [8, 8, 16], strides = [1, 1, 1]} : vector<8x8x32xf32> to vector<8x8x16xf32>
    %130 = vector.extract_strided_slice %124 {offsets = [0, 0, 16], sizes = [8, 8, 16], strides = [1, 1, 1]} : vector<8x8x32xf32> to vector<8x8x16xf32>
    %131 = arith.addf %127, %128 : vector<16xf32>
    %132 = vector.shape_cast %127 : vector<16xf32> to vector<1x1x16xf32>
    %133 = vector.broadcast %132 : vector<1x1x16xf32> to vector<8x8x16xf32>
    %134 = arith.subf %1, %133 : vector<8x8x16xf32>
    %135 = arith.mulf %129, %134 : vector<8x8x16xf32>
    %136 = vector.shape_cast %131 : vector<16xf32> to vector<1x1x16xf32>
    %137 = vector.broadcast %136 : vector<1x1x16xf32> to vector<8x8x16xf32>
    %138 = arith.addf %137, %135 : vector<8x8x16xf32>
    %139 = vector.shape_cast %128 : vector<16xf32> to vector<1x1x16xf32>
    %140 = vector.broadcast %139 : vector<1x1x16xf32> to vector<8x8x16xf32>
    %141 = arith.subf %3, %140 : vector<8x8x16xf32>
    %142 = arith.mulf %130, %141 : vector<8x8x16xf32>
    %143 = arith.addf %138, %142 : vector<8x8x16xf32>
    %c0_63 = arith.constant 0 : index
    %c0_64 = arith.constant 0 : index
    %c0_65 = arith.constant 0 : index
    %c0_66 = arith.constant 0 : index
    %144 = vector.load %arg12[%c0_63, %c0_64, %c0_65, %c0_66] : memref<1x8x8x16xf32, #tpu.memory_space<vmem>>, vector<1x8x8x16xf32>
    %145 = vector.shape_cast %144 : vector<1x8x8x16xf32> to vector<8x8x16xf32>
    %146 = vector.shape_cast %143 : vector<8x8x16xf32> to vector<1x8x8x16xf32>
    tpu.vector_store %arg12[%c0_63, %c0_64, %c0_65, %c0_66], %146 {strides = array<i32>} : memref<1x8x8x16xf32, #tpu.memory_space<vmem>>, vector<1x8x8x16xf32>,
    return
  }
  func.func @transform_0(%arg0: i32, %arg1: i32) -> (i32, i32, i32, i32) {
    %c0_i32 = arith.constant 0 : i32
    %c0_i32_0 = arith.constant 0 : i32
    %c0_i32_1 = arith.constant 0 : i32
    return %arg0, %arg1, %c0_i32, %c0_i32_0 : i32, i32, i32, i32
  }
  func.func @transform_1(%arg0: i32, %arg1: i32) -> (i32, i32, i32, i32) {
    %c0_i32 = arith.constant 0 : i32
    %c0_i32_0 = arith.constant 0 : i32
    %c0_i32_1 = arith.constant 0 : i32
    return %arg0, %arg1, %c0_i32, %c0_i32_0 : i32, i32, i32, i32
  }
  func.func @transform_2(%arg0: i32, %arg1: i32) -> (i32, i32, i32, i32) {
    %c8_i32 = arith.constant 8 : i32
    %0 = arith.muli %arg1, %c8_i32 : i32
    %c1_i32 = arith.constant 1 : i32
    %1 = arith.subi %0, %c1_i32 : i32
    %c0_i32 = arith.constant 0 : i32
    %2 = arith.maxsi %1, %c0_i32 : i32
    %c0_i32_0 = arith.constant 0 : i32
    %c0_i32_1 = arith.constant 0 : i32
    %c0_i32_2 = arith.constant 0 : i32
    return %arg0, %2, %c0_i32_0, %c0_i32_1 : i32, i32, i32, i32
  }
  func.func @transform_3(%arg0: i32, %arg1: i32) -> (i32, i32, i32, i32) {
    %c8_i32 = arith.constant 8 : i32
    %0 = arith.muli %arg1, %c8_i32 : i32
    %c1_i32 = arith.constant 1 : i32
    %1 = arith.subi %0, %c1_i32 : i32
    %c0_i32 = arith.constant 0 : i32
    %2 = arith.maxsi %1, %c0_i32 : i32
    %c0_i32_0 = arith.constant 0 : i32
    %c0_i32_1 = arith.constant 0 : i32
    %c0_i32_2 = arith.constant 0 : i32
    return %arg0, %2, %c0_i32_0, %c0_i32_1 : i32, i32, i32, i32
  }
  func.func @transform_4(%arg0: i32, %arg1: i32) -> (i32, i32, i32, i32) {
    %c1_i32 = arith.constant 1 : i32
    %0 = arith.addi %arg1, %c1_i32 : i32
    %c8_i32 = arith.constant 8 : i32
    %1 = arith.muli %0, %c8_i32 : i32
    %c23_i32 = arith.constant 23 : i32
    %2 = arith.minsi %1, %c23_i32 : i32
    %c0_i32 = arith.constant 0 : i32
    %c0_i32_0 = arith.constant 0 : i32
    %c0_i32_1 = arith.constant 0 : i32
    return %arg0, %2, %c0_i32, %c0_i32_0 : i32, i32, i32, i32
  }
  func.func @transform_5(%arg0: i32, %arg1: i32) -> (i32, i32, i32, i32) {
    %c1_i32 = arith.constant 1 : i32
    %0 = arith.addi %arg1, %c1_i32 : i32
    %c8_i32 = arith.constant 8 : i32
    %1 = arith.muli %0, %c8_i32 : i32
    %c23_i32 = arith.constant 23 : i32
    %2 = arith.minsi %1, %c23_i32 : i32
    %c0_i32 = arith.constant 0 : i32
    %c0_i32_0 = arith.constant 0 : i32
    %c0_i32_1 = arith.constant 0 : i32
    return %arg0, %2, %c0_i32, %c0_i32_0 : i32, i32, i32, i32
  }
  func.func @transform_6(%arg0: i32, %arg1: i32) -> (i32, i32, i32, i32) {
    %c0_i32 = arith.constant 0 : i32
    %c0_i32_0 = arith.constant 0 : i32
    %c0_i32_1 = arith.constant 0 : i32
    %c0_i32_2 = arith.constant 0 : i32
    return %arg0, %c0_i32, %c0_i32_0, %c0_i32_1 : i32, i32, i32, i32
  }
  func.func @transform_7(%arg0: i32, %arg1: i32) -> (i32, i32) {
    %c0_i32 = arith.constant 0 : i32
    %c0_i32_0 = arith.constant 0 : i32
    %c0_i32_1 = arith.constant 0 : i32
    return %c0_i32, %c0_i32_0 : i32, i32
  }
  func.func @transform_8(%arg0: i32, %arg1: i32) -> (i32, i32) {
    %c0_i32 = arith.constant 0 : i32
    %c0_i32_0 = arith.constant 0 : i32
    %c0_i32_1 = arith.constant 0 : i32
    return %c0_i32, %c0_i32_0 : i32, i32
  }
  func.func @transform_9(%arg0: i32, %arg1: i32) -> (i32, i32) {
    %c0_i32 = arith.constant 0 : i32
    %c0_i32_0 = arith.constant 0 : i32
    %c0_i32_1 = arith.constant 0 : i32
    return %c0_i32, %c0_i32_0 : i32, i32
  }
  func.func @transform_10(%arg0: i32, %arg1: i32) -> (i32, i32, i32, i32) {
    %c0_i32 = arith.constant 0 : i32
    %c0_i32_0 = arith.constant 0 : i32
    %c0_i32_1 = arith.constant 0 : i32
    return %arg0, %arg1, %c0_i32, %c0_i32_0 : i32, i32, i32, i32
  }
}

</mosaic_0001>

<bundles_post_ra>
// kernel: tpu_custom_call.1
= control target key start
LH: loop header
LB: loop body
LE: loop exit
PB: predicated region body
PF: predicated region fallthrough
CT: control target
= control target key end

     0   :  { %s1916_s13 = smov 0   ;;  %s1918_s14 = smov 0   ;;  %s2382_s0 = inlined_call_operand.vmem [shape: f32[2,24,8,16], index: 0, kind: input, shape index: {}]   ;;  %s2383_s1 = inlined_call_operand.vmem [shape: f32[2,24,8,16], index: 1, kind: input, shape index: {}]   ;;  %s2384_s2 = inlined_call_operand.vmem [shape: f32[2,24,8,16], index: 2, kind: input, shape index: {}]   ;;  %s2385_s3 = inlined_call_operand.vmem [shape: f32[2,24,8,16], index: 3, kind: input, shape index: {}]   ;;  %s2386_s4 = inlined_call_operand.vmem [shape: f32[2,24,8,16], index: 4, kind: input, shape index: {}]   ;;  %s2387_s5 = inlined_call_operand.vmem [shape: f32[2,24,8,16], index: 5, kind: input, shape index: {}]   ;;  %s2388_s6 = inlined_call_operand.vmem [shape: f32[2,1,1,32], index: 6, kind: input, shape index: {}]   ;;  %s2389_s7 = inlined_call_operand.vmem [shape: f32[9,16], index: 7, kind: input, shape index: {}]   ;;  %s2390_s8 = inlined_call_operand.vmem [shape: f32[16,2], index: 8, kind: input, shape index: {}]   ;;  %s2391_s9 = inlined_call_operand.vmem [shape: f32[2,32], index: 9, kind: input, shape index: {}]   ;;  %s2392_s10 = inlined_call_operand.vmem [shape: f32[2,24,8,16], index: 10, kind: output, shape index: {}]  }
   0x1   :  { %s1920_s15 = smov 0   ;;  %s1922_s16 = smov 0  }
   0x2   :  { %s1924_s17 = smov 0  }
   0x3 LB: > { %s29_s18 = sadd.s32 1, %s1849_s15  ;;  %s32_s19 = sadd.s32 1, %s1853_s16  ;;  %s1857_s17 = sphi %s1924_s17, %s20_s17   ;;  %s1853_s16 = sphi %s1922_s16, %s2399_s16   ;;  %s1849_s15 = sphi %s1920_s15, %s2398_s15   ;;  %s1845_s14 = sphi %s1918_s14, %s2397_s14   ;;  %s1841_s13 = sphi %s1916_s13, %s2396_s13  }
   0x4   : > { %p30_p0 = scmp.ge.s32.totalorder %s29_s18, 3  ;;  %p1618_p1 = scmp.ge.s32.totalorder %s1857_s17, 1 }
   0x5   : > { %p482_p2 = scmp.lt.s32.totalorder %s1857_s17, 7 }
   0x6   : > { %s2401_s18 = smov (%p30_p0, %s29_s18), 0  ;;  %s2403_s19 = smov (!%p30_p0, %s32_s19), %s1853_s16 }
   0x7   : > { %p483_p3 = pnand %p1618_p1, %p482_p2  ;;  %p34_p4 = scmp.ge.s32.totalorder %s2403_s19, 2 }
   0x8   : > { %s1955_s24 = sshll.u32 (!%p483_p3), %s1841_s13, 3  ;;  %p589_p5 = scmp.lt.s32.totalorder (!%p483_p3), %s1845_s14, 1 }
   0x9   : > { %s2405_s19 = smov (%p34_p4, %s2403_s19), 0  ;;  %486 = sbr.rel (%p483_p3) target bundleno = 626 (0x272), region = 60 }
   0xa   : > { %p591_p6 = scmp.lt.s32.totalorder (!%p483_p3), %s1955_s24, 23  ;;  %s1624_s25 = sadd.s32 (!%p483_p3), 4294967295, %s1955_s24 }
   0xb   : > { %p610_p7 = scmp.gt.s32.totalorder (!%p483_p3), %s1624_s25, 0  ;;  %p709_p8 = scmp.gt.s32.totalorder (!%p483_p3), %s1841_s13, 0 }
   0xc   : > { %p1625_p9 = scmp.lt.s32.totalorder (!%p483_p3), %s1624_s25, 23  ;;  %p717_p11 = scmp.lt.s32.totalorder (!%p483_p3), %s1841_s13, 2 }
   0xe   : > { %v959_v0 = vld [vmem:[%s2390_s8 + $0x8] sm:$0xff]  ;;  %v958_v1 = vld [vmem:[%s2390_s8] sm:$0xff]  ;;  %v725_v2 = vlaneseq  ;;  %s2407_s14 = smov (!%p589_p5, %s1845_s14), 1  ;;  %s2409_s25 = smov (!%p610_p7, %s1624_s25), 0  ;;  %vm960_vm3 = vcmask 130048   ;;  %vm1124_vm5 = vcmask 1041408  }
   0xf   : > { %1714 = vmatprep.subr.mxu0 %v959_v0  ;;  %s592_s26 = scalar_select %p591_p6, %s1955_s24, 23  ;;  %v2019_v15 = vld [vmem:[%s2389_s7 + $0x1] ss:$0 sm:$0xff]  ;;  %v2036_v20 = vld [vmem:[%s2389_s7] ss:$0 sm:$0xff]  ;;  %vm1099_vm6 = vcmask 15360  }
  0x10   : > { %1715 = vmatpush3.msra.mxu0 %v959_v0  ;;  %s1960_s27 = smul.u32 24, %s2407_s14  ;;  %s674_s30 = scalar_lea.vmem %s2388_s6, %s2407_s14  ;;  %v1965_v3 = vshrl.u32 %v725_v2, 7  ;;  %v2045_v24 = vld [vmem:[%s2389_s7 + $0x4] ss:$0 sm:$0xff]  ;;  %v2058_v30 = vld [vmem:[%s2389_s7 + $0x2] ss:$0 sm:$0xff] }
  0x11   : > { %1716 = vmatprep.subr.mxu0 %v958_v1  ;;  %v1984_v5 = vld [vmem:[%s674_s30] sm:$0x1]  ;;  %s2411_s25 = smov (!%p1625_p9, %s2409_s25), 23  ;;  %v2079_v35 = vld [vmem:[%s2389_s7 + $0x3] ss:$0 sm:$0xff]  ;;  %s1859_s30 = smov 112  }
  0x12   : > { %1717 = vmatpush3.msra.mxu0 %v958_v1  ;;  %s594_s11 = sadd.s32 %s1960_s27, %s592_s26  ;;  %v1281_v4 = vsub.s32 0, %v1965_v3  ;;  %vm727_vm0 = vcmp.ge.s32.totalorder %v1965_v3, 1  ;;  %vm786_vm1 = vcmp.le.s32.totalorder %v1965_v3, 6  ;;  %s617_s21 = sadd.s32 %s1960_s27, %s2411_s25  ;;  %v2102_v50 = vld [vmem:[%s2389_s7 + $0x5] ss:$0 sm:$0xff] }
  0x13   : > { %s1969_s12 = sshll.u32 %s594_s11, 3  ;;  %v2113_v55 = vld [vmem:[%s2389_s7 + $0x6] ss:$0 sm:$0xff]  ;;  %v2120_v60 = vld [vmem:[%s2389_s7 + $0x7] ss:$0 sm:$0xff] }
  0x14   : > { %s1976_s22 = scalar_lea.vmem %s2382_s0, %s1969_s12  ;;  %s1982_s14 = scalar_lea.vmem %s2383_s1, %s1969_s12  ;;  %v2024_v16 = vrot.slane %v1984_v5, %v1281_v4 }
  0x15   : > { %v1987_v6 = vld [vmem:[%s1976_s22] sm:$0xff]  ;;  %v1990_v7 = vld [vmem:[%s1976_s22 + $0x8] sm:$0xff]  ;;  %v1993_v8 = vld [vmem:[%s1976_s22 + $0x10] sm:$0xff]  ;;  %s713_s26 = scalar_select %p709_p8, 1, 0 }
  0x16   : > { %v1996_v9 = vld [vmem:[%s1982_s14] sm:$0xff]  ;;  %v1999_v10 = vld [vmem:[%s1982_s14 + $0x8] sm:$0xff]  ;;  %v2002_v11 = vld [vmem:[%s1982_s14 + $0x10] sm:$0xff]  ;;  %1314 = vrot.lane.b32.xlu0 %v2024_v16, %s1859_s30  ;;  %s721_s25 = scalar_select %p717_p11, 1, 0 }
  0x17   : > { %v701_v12 = vadd.f32 %v1996_v9, %v1987_v6  ;;  %v2010_v13 = vadd.f32 %v1999_v10, %v1990_v7  ;;  %v2014_v14 = vadd.f32 %v2002_v11, %v1993_v8  ;;  %v2027_v17 = vld [vmem:[%s1976_s22 + $0x18] sm:$0xff]  ;;  %v714_v19 = vstv %s713_s26  ;;  %s1630_s26 = sshll.u32 %s617_s21, 3 }
  0x18   : > { %v2030_v18 = vld [vmem:[%s1982_s14 + $0x18] sm:$0xff]  ;;  %s619_s20 = scalar_lea.vmem %s2384_s2, %s1630_s26  ;;  %s635_s21 = scalar_lea.vmem %s2385_s3, %s1630_s26  ;;  %vm2066_vm2 = vcmp.eq.s32.totalorder %v714_v19, 1 }
  0x19   : > { %v729_v21 = vrot.slane %v701_v12, 7  ;;  %v730_v22 = vrot.slane %v2010_v13, 7  ;;  %v731_v23 = vrot.slane %v2014_v14, 7  ;;  %v2049_v25 = vadd.f32 %v2030_v18, %v2027_v17  ;;  %v710_v36 = vld [vmem:[%s619_s20] sm:$0xff]  ;;  %s1692_s26 = sadd.s32 8, %s1955_s24 }
  0x1a   : > { %v771_v26 = vmul.f32 %v2019_v15, %v701_v12  ;;  %v772_v27 = vmul.f32 %v2019_v15, %v2010_v13  ;;  %v788_v28 = vrot.slane %v701_v12, 1  ;;  %v789_v29 = vrot.slane %v2010_v13, 1  ;;  %v711_v37 = vld [vmem:[%s635_s21] sm:$0xff]  ;;  %p2170_p10 = scmp.lt.s32.totalorder %s1692_s26, 23 }
  0x1b   : > { %v737_v32 = vsel %vm727_vm0, %v729_v21, 0.0  ;;  %v738_v33 = vsel %vm727_vm0, %v730_v22, 0.0  ;;  %v739_v34 = vsel %vm727_vm0, %v731_v23, 0.0  ;;  %v2088_v41 = vmul.f32 %v2045_v24, %v701_v12 }
  0x1c   : > { %v750_v38 = vmul.f32 %v2036_v20, %v737_v32  ;;  %v751_v39 = vmul.f32 %v2036_v20, %v738_v33  ;;  %v796_v40 = vsel %vm786_vm1, %v788_v28, 0.0  ;;  %v712_v42 = vadd.f32 %v711_v37, %v710_v36  ;;  %v2138_v28 = vld [vmem:[%s2389_s7 + $0x8] ss:$0 sm:$0xff]  ;;  %s2413_s26 = smov (!%p2170_p10, %s1692_s26), 23 }
  0x1d   : > { %v752_v43 = vmul.f32 %v2036_v20, %v739_v34  ;;  %v2093_v44 = vsel %vm786_vm1, %v789_v29, 0.0  ;;  %v809_v45 = vmul.f32 %v2058_v30, %v796_v40  ;;  %v832_v49 = vmul.f32 %v2079_v35, %v738_v33  ;;  %s2415_s26 = smov (!%p2170_p10, %s2413_s26), 23 }
  0x1e   : > { %v779_v46 = vadd.f32 %v771_v26, %v750_v38  ;;  %v780_v47 = vadd.f32 %v772_v27, %v751_v39  ;;  %v810_v48 = vmul.f32 %v2058_v30, %v2093_v44  ;;  %v716_v51 = vsel %vm2066_vm2, %v712_v42, 0.0  ;;  %s2231_s24 = sadd.s32 %s1960_s27, %s2415_s26  ;;  %s1860_s26 = smov 16  }
  0x1f   : > { %v831_v52 = vmul.f32 %v2079_v35, %v737_v32  ;;  %v833_v53 = vmul.f32 %v2079_v35, %v739_v34  ;;  %v853_v54 = vmul.f32 %v2045_v24, %v2010_v13  ;;  %v728_v56 = vrot.slane %v716_v51, 7  ;;  %s1643_s27 = sshll.u32 %s2231_s24, 3  ;;  %s2341_s24 = scalar_lea.vmem %s2392_s10, %s1969_s12 }
  0x20   : > { %v787_v57 = vrot.slane %v716_v51, 1  ;;  %v817_v58 = vadd.f32 %v809_v45, %v779_v46  ;;  %v854_v59 = vmul.f32 %v2045_v24, %v2014_v14  ;;  %v770_v61 = vmul.f32 %v2019_v15, %v716_v51  ;;  %s651_s20 = scalar_lea.vmem %s2386_s4, %s1643_s27  ;;  %s667_s21 = scalar_lea.vmem %s2387_s5, %s1643_s27 }
  0x21   : > { %v818_v62 = vadd.f32 %v810_v48, %v780_v47  ;;  %v875_v63 = vmul.f32 %v2102_v50, %v796_v40  ;;  %v876_v0 = vmul.f32 %v2102_v50, %v2093_v44  ;;  %v736_v1 = vsel %vm727_vm0, %v728_v56, 0.0 }
  0x22   : > { %v795_v2 = vsel %vm786_vm1, %v787_v57, 0.0  ;;  %v840_v12 = vadd.f32 %v832_v49, %v817_v58  ;;  %v898_v19 = vmul.f32 %v2113_v55, %v738_v33  ;;  %v749_v21 = vmul.f32 %v2036_v20, %v736_v1  ;;  %v2163_v57 = vld [vmem:[%s1976_s22 + $0x20] sm:$0xff] }
  0x23   : > { %v808_v22 = vmul.f32 %v2058_v30, %v795_v2  ;;  %v841_v23 = vadd.f32 %v833_v53, %v818_v62  ;;  %v919_v26 = vmul.f32 %v2120_v60, %v2010_v13  ;;  %v773_v29 = vmul.f32 %v2019_v15, %v2014_v14  ;;  %v2166_v58 = vld [vmem:[%s1982_s14 + $0x20] sm:$0xff] }
  0x24   : > { %v861_v27 = vadd.f32 %v853_v54, %v840_v12  ;;  %v790_v31 = vrot.slane %v2014_v14, 1  ;;  %v899_v32 = vmul.f32 %v2113_v55, %v739_v34  ;;  %v778_v33 = vadd.f32 %v770_v61, %v749_v21 }
  0x25   : > { %v862_v36 = vadd.f32 %v854_v59, %v841_v23  ;;  %v920_v37 = vmul.f32 %v2120_v60, %v2014_v14  ;;  %v732_v13 = vrot.slane %v2049_v25, 7  ;;  %v781_v39 = vadd.f32 %v773_v29, %v752_v43  ;;  %v2186_v29 = vld [vmem:[%s1976_s22 + $0x28] sm:$0xff] }
  0x26   : > { %v884_v38 = vadd.f32 %v876_v0, %v861_v27  ;;  %v798_v40 = vsel %vm786_vm1, %v790_v31, 0.0  ;;  %v774_v42 = vmul.f32 %v2019_v15, %v2049_v25  ;;  %v816_v34 = vadd.f32 %v808_v22, %v778_v33  ;;  %v2189_v31 = vld [vmem:[%s1982_s14 + $0x28] sm:$0xff] }
  0x27   : > { %v811_v45 = vmul.f32 %v2058_v30, %v798_v40  ;;  %v877_v46 = vmul.f32 %v2102_v50, %v798_v40  ;;  %v943_v14 = vmul.f32 %v2138_v28, %v798_v40  ;;  %v740_v43 = vsel %vm727_vm0, %v732_v13, 0.0 }
  0x28   : > { %v907_v47 = vadd.f32 %v899_v32, %v884_v38  ;;  %v791_v48 = vrot.slane %v2049_v25, 1  ;;  %v921_v49 = vmul.f32 %v2120_v60, %v2049_v25  ;;  %v839_v51 = vadd.f32 %v831_v52, %v816_v34 }
  0x29   : > { %v819_v53 = vadd.f32 %v811_v45, %v781_v39  ;;  %v753_v54 = vmul.f32 %v2036_v20, %v740_v43  ;;  %v834_v56 = vmul.f32 %v2079_v35, %v740_v43  ;;  %v885_v61 = vadd.f32 %v877_v46, %v862_v36 }
  0x2a   : > { %v928_v59 = vadd.f32 %v920_v37, %v907_v47  ;;  %v799_v52 = vsel %vm786_vm1, %v791_v48, 0.0  ;;  %v900_v62 = vmul.f32 %v2113_v55, %v740_v43  ;;  %v860_v0 = vadd.f32 %v2088_v41, %v839_v51 }
  0x2b   : > { %v942_v1 = vmul.f32 %v2138_v28, %v2093_v44  ;;  %v782_v2 = vadd.f32 %v774_v42, %v753_v54  ;;  %v812_v12 = vmul.f32 %v2058_v30, %v799_v52  ;;  %v878_v21 = vmul.f32 %v2102_v50, %v799_v52  ;;  %v2217_v54 = vld [vmem:[%s1976_s22 + $0x30] sm:$0xff] }
  0x2c   : > { %v908_v22 = vadd.f32 %v900_v62, %v885_v61  ;;  %v944_v23 = vmul.f32 %v2138_v28, %v799_v52  ;;  %v705_v27 = vadd.f32 %v2166_v58, %v2163_v57  ;;  %v883_v32 = vadd.f32 %v875_v63, %v860_v0 }
  0x2d   : > { %v951_v41 = vadd.f32 %v943_v14, %v928_v59  ;;  %v842_v33 = vadd.f32 %v834_v56, %v819_v53  ;;  %v855_v44 = vmul.f32 %v2045_v24, %v2049_v25  ;;  %v820_v36 = vadd.f32 %v812_v12, %v782_v2  ;;  %v2220_v56 = vld [vmem:[%s1982_s14 + $0x30] sm:$0xff] }
  0x2e   : > { %v929_v37 = vadd.f32 %v921_v49, %v908_v22  ;;  %v733_v13 = vrot.slane %v705_v27, 7  ;;  %v792_v38 = vrot.slane %v705_v27, 1  ;;  %v906_v39 = vadd.f32 %v898_v19, %v883_v32 }
  0x2f   : > { %v775_v40 = vmul.f32 %v2019_v15, %v705_v27  ;;  %v863_v63 = vadd.f32 %v855_v44, %v842_v33  ;;  %v706_v42 = vadd.f32 %v2189_v31, %v2186_v29  ;;  %v922_v46 = vmul.f32 %v2120_v60, %v705_v27 }
  0x30   : > { %v952_v25 = vadd.f32 %v944_v23, %v929_v37  ;;  %v741_v34 = vsel %vm727_vm0, %v733_v13, 0.0  ;;  %v800_v45 = vsel %vm786_vm1, %v792_v38, 0.0  ;;  %v927_v14 = vadd.f32 %v919_v26, %v906_v39  ;;  %v2243_v39 = vld [vmem:[%s1976_s22 + $0x38] sm:$0xff] }
  0x31   : > { %v754_v19 = vmul.f32 %v2036_v20, %v741_v34  ;;  %v813_v47 = vmul.f32 %v2058_v30, %v800_v45  ;;  %v835_v43 = vmul.f32 %v2079_v35, %v741_v34  ;;  %v879_v48 = vmul.f32 %v2102_v50, %v800_v45 }
  0x32   : > { %v886_v49 = vadd.f32 %v878_v21, %v863_v63  ;;  %v901_v51 = vmul.f32 %v2113_v55, %v741_v34  ;;  %v856_v53 = vmul.f32 %v2045_v24, %v705_v27  ;;  %v950_v26 = vadd.f32 %v942_v1, %v927_v14 }
  0x33   : > { %v783_v59 = vadd.f32 %v775_v40, %v754_v19  ;;  %v945_v52 = vmul.f32 %v2138_v28, %v800_v45  ;;  %v734_v61 = vrot.slane %v706_v42, 7  ;;  %v776_v0 = vmul.f32 %v2019_v15, %v706_v42 }
  0x34   : > { %v909_v62 = vadd.f32 %v901_v51, %v886_v49  ;;  %v793_v2 = vrot.slane %v706_v42, 1  ;;  %v843_v12 = vadd.f32 %v835_v43, %v820_v36  ;;  %1718 = vmatprep.mubr.msk.f32.mxu0 %vm960_vm3, %v950_v26  ;;  %v923_v23 = vmul.f32 %v2120_v60, %v706_v42 }
  0x35   : > { %v821_v21 = vadd.f32 %v813_v47, %v783_v59  ;;  %v742_v22 = vsel %vm727_vm0, %v734_v61, 0.0  ;;  %v707_v1 = vadd.f32 %v2220_v56, %v2217_v54  ;;  %1719 = vmatmul.mubr.msk.f32.vlgmr.msra.gmra.mxu0 %vm960_vm3, %v951_v41  ;;  %v857_v38 = vmul.f32 %v2045_v24, %v706_v42  ;;  %v2246_v41 = vld [vmem:[%s1982_s14 + $0x38] sm:$0xff] }
  0x36   : > { %v930_v27 = vadd.f32 %v922_v46, %v909_v62  ;;  %v755_v32 = vmul.f32 %v2036_v20, %v742_v22  ;;  %v801_v33 = vsel %vm786_vm1, %v793_v2, 0.0  ;;  %v836_v44 = vmul.f32 %v2079_v35, %v742_v22  ;;  %1721 = vmatprep.mubr.msk.f32.mxu0 %vm960_vm3, %v952_v25 }
  0x37   : > { %v814_v36 = vmul.f32 %v2058_v30, %v801_v33  ;;  %v864_v37 = vadd.f32 %v856_v53, %v843_v12  ;;  %v902_v13 = vmul.f32 %v2113_v55, %v742_v22  ;;  %v880_v34 = vmul.f32 %v2102_v50, %v801_v33 }
  0x38   : > { %v953_v40 = vadd.f32 %v945_v52, %v930_v27  ;;  %v784_v63 = vadd.f32 %v776_v0, %v755_v32  ;;  %v735_v45 = vrot.slane %v707_v1, 7  ;;  %v777_v25 = vmul.f32 %v2019_v15, %v707_v1  ;;  %v718_v32 = vld [vmem:[%s651_s20] sm:$0xff] }
  0x39   : > { %v887_v46 = vadd.f32 %v879_v48, %v864_v37  ;;  %v794_v14 = vrot.slane %v707_v1, 1  ;;  %v844_v19 = vadd.f32 %v836_v44, %v821_v21  ;;  %v946_v42 = vmul.f32 %v2138_v28, %v801_v33  ;;  %v719_v33 = vld [vmem:[%s667_s21] sm:$0xff] }
  0x3a   : > { %1722 = vmatmul.mubr.msk.f32.gmra.mxu0 %vm960_vm3, %v953_v40  ;;  %v822_v47 = vadd.f32 %v814_v36, %v784_v63  ;;  %v743_v43 = vsel %vm727_vm0, %v735_v45, 0.0  ;;  %v708_v49 = vadd.f32 %v2246_v41, %v2243_v39  ;;  %v858_v22 = vmul.f32 %v2045_v24, %v707_v1 }
  0x3b   : > { %v910_v51 = vadd.f32 %v902_v13, %v887_v46  ;;  %v756_v53 = vmul.f32 %v2036_v20, %v743_v43  ;;  %v802_v15 = vsel %vm786_vm1, %v794_v14, 0.0  ;;  %v837_v48 = vmul.f32 %v2079_v35, %v743_v43 }
  0x3c   : > { %v815_v26 = vmul.f32 %v2058_v30, %v802_v15  ;;  %v865_v59 = vadd.f32 %v857_v38, %v844_v19  ;;  %v903_v52 = vmul.f32 %v2113_v55, %v743_v43  ;;  %v924_v20 = vmul.f32 %v2120_v60, %v707_v1 }
  0x3d   : > { %v931_v61 = vadd.f32 %v923_v23, %v910_v51  ;;  %v785_v62 = vadd.f32 %v777_v25, %v756_v53  ;;  %v881_v0 = vmul.f32 %v2102_v50, %v802_v15  ;;  %v824_v2 = vrot.slane %v708_v49, 7 }
  0x3e   : > { %v888_v12 = vadd.f32 %v880_v34, %v865_v59  ;;  %v845_v21 = vadd.f32 %v837_v48, %v822_v47  ;;  %v868_v27 = vrot.slane %v708_v49, 1  ;;  %v947_v36 = vmul.f32 %v2138_v28, %v802_v15 }
  0x3f   : > { %v954_v30 = vadd.f32 %v946_v42, %v931_v61  ;;  %v823_v44 = vadd.f32 %v815_v26, %v785_v62  ;;  %v825_v23 = vsel %vm727_vm0, %v824_v2, 0.0  ;;  %v925_v63 = vmul.f32 %v2120_v60, %v708_v49 }
  0x40   : > { %v911_v37 = vadd.f32 %v903_v52, %v888_v12  ;;  %v838_v13 = vmul.f32 %v2079_v35, %v825_v23  ;;  %v866_v38 = vadd.f32 %v858_v22, %v845_v21  ;;  %v869_v40 = vsel %vm786_vm1, %v868_v27, 0.0  ;;  %v1098_v12 = vld [vmem:[%s2391_s9] sm:$0x3] }
  0x41   : > { %1724 = vmatprep.mubr.msk.f32.mxu0 %vm960_vm3, %v954_v30  ;;  %v904_v1 = vmul.f32 %v2113_v55, %v825_v23  ;;  %v720_v34 = vadd.f32 %v719_v33, %v718_v32  ;;  %v722_v25 = vstv %s721_s25  ;;  %v882_v19 = vmul.f32 %v2102_v50, %v869_v40  ;;  %1730 = vmatprep.subr.msk.mxu1 %vm1124_vm5, %v1098_v12 }
  0x42   : > { %v932_v45 = vadd.f32 %v924_v20, %v911_v37  ;;  %v889_v46 = vadd.f32 %v881_v0, %v866_v38  ;;  %v846_v14 = vadd.f32 %v838_v13, %v823_v44  ;;  %vm723_vm4 = vcmp.eq.s32.totalorder %v722_v25, 1  ;;  %1731 = vmatpush3.msk.msra.mxu1 %vm1124_vm5, %v1098_v12 }
  0x43   : > { %v859_v35 = vmul.f32 %v2045_v24, %v708_v49  ;;  %v948_v43 = vmul.f32 %v2138_v28, %v869_v40  ;;  %v724_v51 = vsel %vm723_vm4, %v720_v34, 0.0 }
  0x44   : > { %v955_v47 = vadd.f32 %v947_v36, %v932_v45  ;;  %v912_v42 = vadd.f32 %v904_v1, %v889_v46  ;;  %v891_v15 = vrot.slane %v724_v51, 7  ;;  %v935_v48 = vrot.slane %v724_v51, 1 }
  0x45   : > { %v867_v53 = vadd.f32 %v859_v35, %v846_v14  ;;  %v926_v49 = vmul.f32 %v2120_v60, %v724_v51 }
  0x46   : > { %1725 = vmatmul.mubr.msk.f32.gmra.mxu0 %vm960_vm3, %v955_v47  ;;  %v933_v26 = vadd.f32 %v925_v63, %v912_v42  ;;  %v892_v52 = vsel %vm727_vm0, %v891_v15, 0.0  ;;  %v936_v50 = vsel %vm786_vm1, %v935_v48, 0.0 }
  0x47   : > { %v890_v59 = vadd.f32 %v882_v19, %v867_v53  ;;  %v905_v24 = vmul.f32 %v2113_v55, %v892_v52  ;;  %v949_v62 = vmul.f32 %v2138_v28, %v936_v50 }
  0x48   : > { %v956_v20 = vadd.f32 %v948_v43, %v933_v26 }
  0x49   : > { %v913_v61 = vadd.f32 %v905_v24, %v890_v59 }
  0x4a   : > { %1727 = vmatprep.mubr.msk.f32.mxu0 %vm960_vm3, %v956_v20 }
  0x4b   : > { %v934_v0 = vadd.f32 %v926_v49, %v913_v61 }
  0x4d   : > { %v957_v2 = vadd.f32 %v949_v62, %v934_v0 }
  0x4f   : > { %1728 = vmatmul.mubr.msk.f32.gmra.mxu0 %vm960_vm3, %v957_v2 }
  0x88   : > { %v1315_v21 = vpop.permute.xlu0 %1314 }
  0x89   : > { %v1318_v55 = vsub.f32 %v1999_v10, %v1315_v21  ;;  %v1317_v60 = vsub.f32 %v1996_v9, %v1315_v21  ;;  %v1319_v28 = vsub.f32 %v2002_v11, %v1315_v21  ;;  %v1320_v22 = vsub.f32 %v2030_v18, %v1315_v21 }
  0x8a   : > { %v1321_v27 = vsub.f32 %v2166_v58, %v1315_v21  ;;  %v1322_v32 = vsub.f32 %v2189_v31, %v1315_v21  ;;  %v1323_v33 = vsub.f32 %v2220_v56, %v1315_v21  ;;  %v1324_v10 = vsub.f32 %v2246_v41, %v1315_v21 }
  0x8b   : > { %1335 = vrot.lane.b32.xlu1 %v1318_v55, %s1860_s26  ;;  %1333 = vrot.lane.b32.xlu0 %v1317_v60, %s1860_s26 }
  0x8f   : > { %1337 = vrot.lane.b32.xlu1 %v1319_v28, %s1860_s26  ;;  %1339 = vrot.lane.b32.xlu0 %v1320_v22, %s1860_s26 }
  0x93   : > { %1341 = vrot.lane.b32.xlu1 %v1321_v27, %s1860_s26  ;;  %1343 = vrot.lane.b32.xlu0 %v1322_v32, %s1860_s26 }
  0x97   : > { %1345 = vrot.lane.b32.xlu1 %v1323_v33, %s1860_s26  ;;  %1347 = vrot.lane.b32.xlu0 %v1324_v10, %s1860_s26 }
  0x9b   : > { %1275 = vrot.lane.b32.xlu1 %v1984_v5, %s1859_s30 }
  0xf5   : > { %v1720_v9 = vpop.f32.mrf.mxu0 }
  0xf6   : > { %v1091_v30 = vmax.f32 %v1720_v9, 0.0 }
  0xf7   : > { %v1051_v11 = vpop.f32.mrf.mxu0 }
  0xf8   : > { %v1090_v18 = vmax.f32 %v1051_v11, 0.0 }
  0xfa   : > { %v1723_v58 = vpop.f32.mrf.mxu0  ;;  %1732 = vmatprep.mubr.msk.f32.mxu1 %vm1099_vm6, %v1090_v18 }
  0xfb   : > { %1733 = vmatmul.mubr.msk.f32.vlgmr.msra.gmra.mxu1 %vm1099_vm6, %v1091_v30  ;;  %v1093_v44 = vmax.f32 %v1723_v58, 0.0 }
  0xfc   : > { %v1061_v31 = vpop.f32.mrf.mxu0 }
  0xfd   : > { %v1092_v56 = vmax.f32 %v1061_v31, 0.0  ;;  %v1334_v27 = vpop.permute.xlu0 %1333  ;;  %v1336_v33 = vpop.permute.xlu1 %1335 }
  0xff   : > { %1735 = vmatprep.mubr.msk.f32.mxu1 %vm1099_vm6, %v1092_v56 }
 0x100   : > { %1736 = vmatmul.mubr.msk.f32.gmra.mxu1 %vm1099_vm6, %v1093_v44 }
 0x101   : > { %v1340_v44 = vpop.permute.xlu0 %1339 }
 0x106   : > { %v1726_v41 = vpop.f32.mrf.mxu0 }
 0x107   : > { %v1095_v37 = vmax.f32 %v1726_v41, 0.0 }
 0x108   : > { %v1071_v36 = vpop.f32.mrf.mxu0 }
 0x109   : > { %v1094_v23 = vmax.f32 %v1071_v36, 0.0 }
 0x10b   : > { %1738 = vmatprep.mubr.msk.f32.mxu1 %vm1099_vm6, %v1094_v23  ;;  %v1338_v23 = vpop.permute.xlu1 %1337 }
 0x10c   : > { %1739 = vmatmul.mubr.msk.f32.gmra.mxu1 %vm1099_vm6, %v1095_v37 }
 0x10f   : > { %v1729_v13 = vpop.f32.mrf.mxu0 }
 0x110   : > { %v1097_v1 = vmax.f32 %v1729_v13, 0.0 }
 0x111   : > { %v1081_v38 = vpop.f32.mrf.mxu0 }
 0x112   : > { %v1096_v40 = vmax.f32 %v1081_v38, 0.0 }
 0x114   : > { %1741 = vmatprep.mubr.msk.f32.mxu1 %vm1099_vm6, %v1096_v40 }
 0x115   : > { %1742 = vmatmul.mubr.msk.f32.gmra.mxu1 %vm1099_vm6, %v1097_v1 }
 0x1bb   : > { %v1734_v63 = vpop.f32.mrf.mxu1 }
 0x1bc   : > { %v1234_v34 = vsub.f32 0.0, %v1734_v63 }
 0x1bd   : > { %v1194_v45 = vpop.f32.mrf.mxu1 }
 0x1be   : > { %v1243_v46 = vmul.f32 1.442695, %v1234_v34  ;;  %v1233_v25 = vsub.f32 0.0, %v1194_v45  ;;  %v1344_v34 = vpop.permute.xlu0 %1343 }
 0x1c0   : > { %v1737_v14 = vpop.f32.mrf.mxu1  ;;  %1787 = vpow2.f32 %v1243_v46  ;;  %v1241_v19 = vmul.f32 1.442695, %v1233_v25  ;;  %v1342_v25 = vpop.permute.xlu1 %1341 }
 0x1c1   : > { %v1236_v35 = vsub.f32 0.0, %v1737_v14 }
 0x1c2   : > { %v1204_v47 = vpop.f32.mrf.mxu1  ;;  %1789 = vpow2.f32 %v1241_v19 }
 0x1c3   : > { %v1247_v42 = vmul.f32 1.442695, %v1236_v35  ;;  %v1235_v43 = vsub.f32 0.0, %v1204_v47  ;;  %v1348_v35 = vpop.permute.xlu0 %1347 }
 0x1c5   : > { %1791 = vpow2.f32 %v1247_v42  ;;  %v1245_v51 = vmul.f32 1.442695, %v1235_v43  ;;  %v1346_v43 = vpop.permute.xlu1 %1345 }
 0x1c7   : > { %1793 = vpow2.f32 %v1245_v51 }
 0x1cc   : > { %v1740_v53 = vpop.f32.mrf.mxu1 }
 0x1cd   : > { %v1238_v15 = vsub.f32 0.0, %v1740_v53  ;;  %v1788_v48 = vpop.eup %1787  ;;  %v1276_v53 = vpop.permute.xlu1 %1275 }
 0x1ce   : > { %v1214_v26 = vpop.f32.mrf.mxu1  ;;  %v1258_v59 = vadd.f32 1.0, %v1788_v48  ;;  %v1285_v48 = vsub.f32 %v1990_v7, %v2024_v16 }
 0x1cf   : > { %v1251_v52 = vmul.f32 1.442695, %v1238_v15  ;;  %v1237_v50 = vsub.f32 0.0, %v1214_v26  ;;  %v1790_v20 = vpop.eup %1789  ;;  %v1278_v15 = vadd.f32 %v1276_v53, %v1984_v5  ;;  %v1284_v26 = vsub.f32 %v1987_v6, %v2024_v16 }
 0x1d0   : > { %1795 = vrcp.f32 %v1258_v59  ;;  %v1257_v24 = vadd.f32 1.0, %v1790_v20 }
 0x1d1   : > { %v1249_v49 = vmul.f32 1.442695, %v1237_v50  ;;  %1797 = vpow2.f32 %v1251_v52  ;;  %v1304_v59 = vrot.slane %v1278_v15, %v1281_v4  ;;  %v1287_v50 = vsub.f32 %v2027_v17, %v2024_v16 }
 0x1d2   : > { %v1792_v61 = vpop.eup %1791  ;;  %1799 = vrcp.f32 %v1257_v24  ;;  %v1286_v24 = vsub.f32 %v1993_v8, %v2024_v16 }
 0x1d3   : > { %v1260_v62 = vadd.f32 1.0, %v1792_v61  ;;  %1801 = vpow2.f32 %v1249_v49 }
 0x1d4   : > { %v1794_v0 = vpop.eup %1793 }
 0x1d5   : > { %1803 = vrcp.f32 %v1260_v62  ;;  %v1259_v2 = vadd.f32 1.0, %v1794_v0  ;;  %v1743_v12 = vpop.f32.mrf.mxu1 }
 0x1d6   : > { %v1240_v21 = vsub.f32 0.0, %v1743_v12 }
 0x1d7   : > { %1805 = vrcp.f32 %v1259_v2  ;;  %v1224_v55 = vpop.f32.mrf.mxu1 }
 0x1d8   : > { %v1255_v60 = vmul.f32 1.442695, %v1240_v21  ;;  %v1239_v28 = vsub.f32 0.0, %v1224_v55  ;;  %v1289_v55 = vsub.f32 %v2186_v29, %v2024_v16  ;;  %v1290_v29 = vsub.f32 %v2217_v54, %v2024_v16 }
 0x1da   : > { %1807 = vpow2.f32 %v1255_v60  ;;  %v1253_v22 = vmul.f32 1.442695, %v1239_v28  ;;  %v1288_v60 = vsub.f32 %v2163_v57, %v2024_v16 }
 0x1dc   : > { %1809 = vpow2.f32 %v1253_v22 }
 0x1dd   : > { %v1796_v32 = vpop.eup %1795 }
 0x1de   : > { %v1798_v10 = vpop.eup %1797  ;;  %v1358_v9 = vmul.f32 %v1796_v32, %v1336_v33  ;;  %v1293_v52 = vmul.f32 %v1796_v32, %v1285_v48  ;;  %v1291_v33 = vsub.f32 %v2243_v39, %v2024_v16 }
 0x1df   : > { %v1800_v11 = vpop.eup %1799  ;;  %v1262_v18 = vadd.f32 1.0, %v1798_v10 }
 0x1e0   : > { %v1802_v30 = vpop.eup %1801  ;;  %v1357_v58 = vmul.f32 %v1800_v11, %v1334_v27  ;;  %1375 = vrot.lane.b32.xlu1 %v1358_v9, %s1859_s30  ;;  %v1292_v20 = vmul.f32 %v1800_v11, %v1284_v26  ;;  %v1307_v49 = vadd.f32 %v1304_v59, %v1293_v52 }
 0x1e1   : > { %1811 = vrcp.f32 %v1262_v18  ;;  %v1261_v56 = vadd.f32 1.0, %v1802_v30 }
 0x1e2   : > { %v1804_v31 = vpop.eup %1803  ;;  %1373 = vrot.lane.b32.xlu0 %v1357_v58, %s1859_s30  ;;  %v1306_v5 = vadd.f32 %v1304_v59, %v1292_v20 }
 0x1e3   : > { %v1360_v41 = vmul.f32 %v1804_v31, %v1340_v44  ;;  %1813 = vrcp.f32 %v1261_v56  ;;  %v1295_v61 = vmul.f32 %v1804_v31, %v1287_v50 }
 0x1e4   : > { %v1806_v36 = vpop.eup %1805 }
 0x1e5   : > { %v1359_v37 = vmul.f32 %v1806_v36, %v1338_v23  ;;  %1379 = vrot.lane.b32.xlu1 %v1360_v41, %s1859_s30  ;;  %v1294_v6 = vmul.f32 %v1806_v36, %v1286_v24  ;;  %v1309_v8 = vadd.f32 %v1304_v59, %v1295_v61 }
 0x1e7   : > { %1377 = vrot.lane.b32.xlu0 %v1359_v37, %s1859_s30  ;;  %v1808_v13 = vpop.eup %1807  ;;  %v1308_v2 = vadd.f32 %v1304_v59, %v1294_v6 }
 0x1e8   : > { %v1264_v38 = vadd.f32 1.0, %v1808_v13 }
 0x1e9   : > { %v1810_v40 = vpop.eup %1809 }
 0x1ea   : > { %1815 = vrcp.f32 %v1264_v38  ;;  %v1263_v1 = vadd.f32 1.0, %v1810_v40 }
 0x1ec   : > { %1817 = vrcp.f32 %v1263_v1 }
 0x1ee   : > { %v1812_v63 = vpop.eup %1811 }
 0x1ef   : > { %v1362_v45 = vmul.f32 %v1812_v63, %v1344_v34  ;;  %v1297_v28 = vmul.f32 %v1812_v63, %v1289_v55 }
 0x1f0   : > { %v1814_v46 = vpop.eup %1813 }
 0x1f1   : > { %v1361_v14 = vmul.f32 %v1814_v46, %v1342_v25  ;;  %1383 = vrot.lane.b32.xlu1 %v1362_v45, %s1859_s30  ;;  %v1296_v22 = vmul.f32 %v1814_v46, %v1288_v60  ;;  %v1311_v27 = vadd.f32 %v1304_v59, %v1297_v28 }
 0x1f3   : > { %1381 = vrot.lane.b32.xlu0 %v1361_v14, %s1859_s30  ;;  %v1310_v9 = vadd.f32 %v1304_v59, %v1296_v22 }
 0x1f7   : > { %v1816_v19 = vpop.eup %1815 }
 0x1f8   : > { %v1364_v47 = vmul.f32 %v1816_v19, %v1348_v35  ;;  %v1299_v30 = vmul.f32 %v1816_v19, %v1291_v33 }
 0x1f9   : > { %v1818_v42 = vpop.eup %1817 }
 0x1fa   : > { %v1363_v51 = vmul.f32 %v1818_v42, %v1346_v43  ;;  %1387 = vrot.lane.b32.xlu1 %v1364_v47, %s1859_s30  ;;  %v1298_v57 = vmul.f32 %v1818_v42, %v1290_v29  ;;  %v1313_v58 = vadd.f32 %v1304_v59, %v1299_v30 }
 0x1fc   : > { %1385 = vrot.lane.b32.xlu0 %v1363_v51, %s1859_s30  ;;  %v1312_v44 = vadd.f32 %v1304_v59, %v1298_v57 }
 0x252   : > { %v1376_v3 = vpop.permute.xlu1 %1375 }
 0x253   : > { %v1398_v4 = vadd.f32 %v1376_v3, %v1307_v49 }
 0x254   : > { %v1374_v7 = vpop.permute.xlu0 %1373 }
 0x255   : > { %1406 = vst.msk [vmem:[%s2341_s24 + $0x8] sm:$0xff] %vm960_vm3, %v1398_v4  ;;  %v1397_v17 = vadd.f32 %v1374_v7, %v1306_v5 }
 0x257   : > { %v1380_v62 = vpop.permute.xlu1 %1379  ;;  %1405 = vst.msk [vmem:[%s2341_s24] sm:$0xff] %vm960_vm3, %v1397_v17 }
 0x258   : > { %v1400_v0 = vadd.f32 %v1380_v62, %v1309_v8 }
 0x259   : > { %v1378_v12 = vpop.permute.xlu0 %1377 }
 0x25a   : > { %1408 = vst.msk [vmem:[%s2341_s24 + $0x18] sm:$0xff] %vm960_vm3, %v1400_v0  ;;  %v1399_v21 = vadd.f32 %v1378_v12, %v1308_v2 }
 0x25c   : > { %1407 = vst.msk [vmem:[%s2341_s24 + $0x10] sm:$0xff] %vm960_vm3, %v1399_v21 }
 0x263   : > { %v1384_v32 = vpop.permute.xlu1 %1383 }
 0x264   : > { %v1402_v10 = vadd.f32 %v1384_v32, %v1311_v27 }
 0x265   : > { %v1382_v11 = vpop.permute.xlu0 %1381 }
 0x266   : > { %1410 = vst.msk [vmem:[%s2341_s24 + $0x28] sm:$0xff] %vm960_vm3, %v1402_v10  ;;  %v1401_v18 = vadd.f32 %v1382_v11, %v1310_v9 }
 0x268   : > { %1409 = vst.msk [vmem:[%s2341_s24 + $0x20] sm:$0xff] %vm960_vm3, %v1401_v18 }
 0x26c   : > { %v1388_v31 = vpop.permute.xlu1 %1387 }
 0x26d   : > { %v1404_v56 = vadd.f32 %v1388_v31, %v1313_v58 }
 0x26e   : > { %v1386_v41 = vpop.permute.xlu0 %1385 }
 0x26f   : > { %1412 = vst.msk [vmem:[%s2341_s24 + $0x38] sm:$0xff] %vm960_vm3, %v1404_v56  ;;  %v1403_v39 = vadd.f32 %v1386_v41, %v1312_v44 }
 0x271   : > { %1411 = vst.msk [vmem:[%s2341_s24 + $0x30] sm:$0xff] %vm960_vm3, %v1403_v39 }
 0x272 PF: > { %s20_s17 = sadd.s32 1, %s1857_s17   ;;  %s2396_s13 = smov %s1849_s15 }
 0x273   : > { %p17_p12 = scmp.ge.s32.totalorder %s20_s17, 8   ;;  %s2397_s14 = smov %s1853_s16 }
 0x274   : > { %s2398_s15 = smov %s2401_s18  ;;  %s2399_s16 = smov %s2405_s19 }
 0x275   :  { %19 = sbr.rel (!%p17_p12) target bundleno = 3 (0x3), region = 108 }

</bundles_post_ra>
